<compile_context>
chip_gen: v7x
topology: tpu7x:2x2x1
jax: 0.10.0
libtpu: 0.0.40
codegen_flags: <defaults>
</compile_context>

<pallas_src>
import functools

import jax
import jax.numpy as jnp
import numpy as np
from jax import lax
from jax.experimental import pallas as pl
from jax.experimental.pallas import tpu as pltpu

LARGE_NUMBER = 10000.0


def _ncl_kernel(zq_ref, zk_ref, out_ref, m_scr, l_scr, pos_scr, *,
                n, tm, tn, multiplier):
    i = pl.program_id(0)
    j = pl.program_id(1)

    @pl.when(j == 0)
    def _():
        m_scr[...] = jnp.full(m_scr.shape, -jnp.inf, dtype=m_scr.dtype)
        l_scr[...] = jnp.zeros_like(l_scr)
        pos_scr[...] = jnp.zeros_like(pos_scr)

    # (tm, tn) tile of (z/tau) @ z.T — contract the feature (lane) axis of both
    # operands on the MXU, accumulate in f32.  1/tau is already folded into zq.
    s = lax.dot_general(
        zq_ref[...], zk_ref[...], (((1,), (1,)), ((), ())),
        preferred_element_type=jnp.float32,
    )

    # Scalar tile geometry.  Global delta = col - row = base + (lc - lr),
    # with lc in [0, tn), lr in [0, tm)  =>  delta in [base-(tm-1), base+(tn-1)].
    base = j * tn - i * tm
    delta_lo = base - (tm - 1)
    delta_hi = base + (tn - 1)

    # Does this tile straddle the diagonal?
    has_diag = jnp.logical_and(delta_lo <= 0, delta_hi >= 0)

    # Positive-pair offsets: col == (row + off) % n  <=>  delta == off or off-n.
    offs = []
    for k in range(1, multiplier):
        off = k * (n // multiplier)
        offs.extend((off, off - n))
    has_pos = functools.reduce(
        jnp.logical_or,
        [jnp.logical_and(delta_lo <= o, o <= delta_hi) for o in offs])

    def local_delta():
        # Single tile-local delta (lc - lr); compared against scalar RHS.
        return (lax.broadcasted_iota(jnp.int32, (tm, tn), 1)
                - lax.broadcasted_iota(jnp.int32, (tm, tn), 0))

    # Positive-logit accumulation: only on the thin band of tiles that can
    # contain positives (skips compare/select/row-sum on >90% of tiles).
    @pl.when(has_pos)
    def _():
        ld = local_delta()
        pos = functools.reduce(jnp.logical_or,
                               [ld == (o - base) for o in offs])
        pos_scr[...] += jnp.sum(jnp.where(pos, s, jnp.float32(0.0)),
                                axis=1, keepdims=True)

    # Online softmax update (running max / running sum of exp per row).
    def softmax_update(s_eff):
        m_prev = m_scr[...]
        m_new = jnp.maximum(m_prev, jnp.max(s_eff, axis=1, keepdims=True))
        alpha = jnp.exp(m_prev - m_new)
        l_scr[...] = alpha * l_scr[...] + jnp.sum(jnp.exp(s_eff - m_new),
                                                  axis=1, keepdims=True)
        m_scr[...] = m_new

    # Diagonal masking only on tiles that straddle the diagonal.
    # TODO(synk): mirrors the original's latent risk that an unnormalized
    #             diagonal logit z_i.z_i/tau could exceed LARGE_NUMBER.
    @pl.when(has_diag)
    def _():
        ld = local_delta()
        softmax_update(jnp.where(ld == -base, jnp.float32(-LARGE_NUMBER), s))

    @pl.when(jnp.logical_not(has_diag))
    def _():
        softmax_update(s)

    @pl.when(j == pl.num_programs(1) - 1)
    def _():
        # Per-row loss contribution: (m-1) * lse_row - sum(positive logits).
        lse = jnp.log(l_scr[...]) + m_scr[...]
        out_ref[...] = jnp.float32(multiplier - 1) * lse - pos_scr[...]


def _round_up(x, m):
    return ((x + m - 1) // m) * m


def _choose_tile(n, cap):
    """Largest divisor of n <= cap, preferring multiples of 128, then 8."""
    cap = min(cap, n)
    for align in (128, 8):
        t = (cap // align) * align
        while t >= align:
            if n % t == 0:
                return t
            t -= align
    return n  # no aligned divisor -> single tile (still correct)


def _fit_tiles(n, dp, itemsize, tm, tn, budget):
    """Shrink (tn first, then tm) until the estimated VMEM footprint fits."""
    def est(tm_, tn_):
        return (2 * (tm_ + tn_) * dp * itemsize   # double-buffered zq/zk blocks
                + 4 * tm_ * tn_ * 4               # f32 logits tile + exp/mask temps
                + 8 * tm_ * 4)                    # row scratch + output block
    while est(tm, tn) > budget and tn > 8:
        new_tn = _choose_tile(n, max(tn // 2, 8))
        if new_tn >= tn:
            break
        tn = new_tn
    while est(tm, tn) > budget and tm > 8:
        new_tm = _choose_tile(n, max(tm // 2, 8))
        if new_tm >= tm:
            break
        tm = new_tm
    return tm, tn


def normal_contrastive_loss(z, *, multiplier=2, tau=0.5,
                            matmul_dtype=jnp.bfloat16,
                            tm_cap=512, tn_cap=1024,
                            vmem_budget_bytes=36 * 1024 * 1024):
    n, d = z.shape
    assert n % multiplier == 0 and multiplier >= 2

    # Fold 1/tau into the row operand (O(N*D) wrapper op, hidden by XLA) and
    # optionally downcast matmul operands to bf16 (MXU-native); accumulation
    # stays f32 inside the kernel.  Pass matmul_dtype=None for full precision.
    mdt = z.dtype if matmul_dtype is None else jnp.dtype(matmul_dtype)
    dp = _round_up(d, 128)          # lane-dense MXU contraction
    zp = z if dp == d else jnp.pad(z, ((0, 0), (0, dp - d)))
    zq = (zp * jnp.asarray(1.0 / tau, zp.dtype)).astype(mdt)
    zk = zp.astype(mdt)
    itemsize = jnp.dtype(mdt).itemsize

    # Large row tile (zk streaming scales with 1/tm), capped at n//2 so the
    # parallel axis still splits across v7x's two TensorCores; shrink to fit
    # a VMEM budget that is safe on v5e/v6e (128 MiB) and v7x (64 MiB).
    tm = _choose_tile(n, min(tm_cap, max(n // 2, 8)))
    tn = _choose_tile(n, tn_cap)
    tm, tn = _fit_tiles(n, dp, itemsize, tm, tn, vmem_budget_bytes)
    grid_i, grid_j = n // tm, n // tn

    kernel = functools.partial(_ncl_kernel, n=n, tm=tm, tn=tn,
                               multiplier=multiplier)

    row_losses = pl.pallas_call(
        kernel,
        out_shape=jax.ShapeDtypeStruct((n, 1), jnp.float32),
        grid_spec=pltpu.PrefetchScalarGridSpec(
            num_scalar_prefetch=0,
            grid=(grid_i, grid_j),
            in_specs=[
                pl.BlockSpec((tm, dp), lambda i, j: (i, 0)),  # row block (scaled)
                pl.BlockSpec((tn, dp), lambda i, j: (j, 0)),  # col block
            ],
            out_specs=pl.BlockSpec((tm, 1), lambda i, j: (i, 0)),
            scratch_shapes=[
                pltpu.VMEM((tm, 1), jnp.float32),  # running row max
                pltpu.VMEM((tm, 1), jnp.float32),  # running sum of exp
                pltpu.VMEM((tm, 1), jnp.float32),  # positive-logit accumulator
            ],
        ),
        compiler_params=pltpu.CompilerParams(
            dimension_semantics=("parallel", "arbitrary"),
            vmem_limit_bytes=48 * 1024 * 1024),
        cost_estimate=pl.CostEstimate(
            flops=2 * n * n * dp,
            transcendentals=n * n,
            # zk re-streamed once per row tile + zq once + output rows.
            bytes_accessed=(grid_i + 1) * n * dp * itemsize + n * 4),
    )(zq, zk)

    return jnp.sum(row_losses) / jnp.float32(n) / jnp.float32(multiplier - 1)


def _reference(z, multiplier=2, tau=0.5):
    # Plain-JAX reference mirroring the PyTorch forward (validation only).
    n = z.shape[0]
    zs = z / np.sqrt(tau)
    logits = zs @ zs.T
    logits = logits.at[jnp.arange(n), jnp.arange(n)].set(-LARGE_NUMBER)
    logprob = jax.nn.log_softmax(logits, axis=1)
    m = multiplier
    labels = (np.repeat(np.arange(n), m) + np.tile(np.arange(m) * n // m, n)) % n
    labels = labels.reshape(n, m)[:, 1:].reshape(-1)
    rows = np.repeat(np.arange(n), m - 1)
    return -logprob[rows, labels].sum() / n / (m - 1)


if __name__ == "__main__":
    key = jax.random.PRNGKey(0)

    # 1) Small case (single tile), f32 matmul path: tight tolerance.
    n, d = 8, 32
    z = jax.random.normal(key, (n, d), dtype=jnp.float32)
    loss = normal_contrastive_loss(z, multiplier=2, tau=0.5,
                                   matmul_dtype=jnp.float32)
    jax.block_until_ready(loss)
    ref = _reference(z, multiplier=2, tau=0.5)
    assert np.allclose(np.asarray(loss), np.asarray(ref),
                       rtol=1e-4, atol=1e-4), (loss, ref)

    # 2) Multi-tile case (grid = (4, 4)) exercising diag / positive-band /
    #    off-band guard paths, f32 matmul path: tight tolerance.
    n2, d2 = 64, 32
    z2 = jax.random.normal(jax.random.PRNGKey(1), (n2, d2), dtype=jnp.float32)
    loss2 = normal_contrastive_loss(z2, multiplier=2, tau=0.5,
                                    matmul_dtype=jnp.float32,
                                    tm_cap=16, tn_cap=16)
    jax.block_until_ready(loss2)
    ref2 = _reference(z2, multiplier=2, tau=0.5)
    assert np.allclose(np.asarray(loss2), np.asarray(ref2),
                       rtol=1e-4, atol=1e-4), (loss2, ref2)

    # 3) Default (bf16 operands, f32 accumulation) path: loose tolerance.
    loss3 = normal_contrastive_loss(z2, multiplier=2, tau=0.5,
                                    tm_cap=16, tn_cap=16)
    jax.block_until_ready(loss3)
    assert np.allclose(np.asarray(loss3), np.asarray(ref2),
                       rtol=5e-2, atol=5e-2), (loss3, ref2)

    # 4) multiplier=4 (several positive offsets per row), f32 path.
    n4, d4 = 16, 32
    z4 = jax.random.normal(jax.random.PRNGKey(2), (n4, d4), dtype=jnp.float32)
    loss4 = normal_contrastive_loss(z4, multiplier=4, tau=0.5,
                                    matmul_dtype=jnp.float32)
    jax.block_until_ready(loss4)
    ref4 = _reference(z4, multiplier=4, tau=0.5)
    assert np.allclose(np.asarray(loss4), np.asarray(ref4),
                       rtol=1e-4, atol=1e-4), (loss4, ref4)

    print("KERNEL_OK")
</pallas_src>

<mosaic_0001>
module attributes {stable_mosaic.version = 11 : i64} {
  func.func @_ncl_kernel(%arg0: i32, %arg1: i32, %arg2: memref<8x128xf32, #tpu.memory_space<vmem>>, %arg3: memref<8x128xf32, #tpu.memory_space<vmem>>, %arg4: memref<8x1xf32, #tpu.memory_space<vmem>>, %arg5: memref<8x1xf32, #tpu.memory_space<vmem>>, %arg6: memref<8x1xf32, #tpu.memory_space<vmem>>, %arg7: memref<8x1xf32, #tpu.memory_space<vmem>>) attributes {dimension_semantics = [#tpu.dimension_semantics<parallel>, #tpu.dimension_semantics<arbitrary>], iteration_bounds = array<i64: 1, 1>, scalar_prefetch = 0 : i64, scratch_operands = 3 : i64, tpu.core_type = #tpu.core_type<tc>, window_params = [{transform_indices = @transform_0, window_bounds = array<i64: 8, 128>}, {transform_indices = @transform_1, window_bounds = array<i64: 8, 128>}, {transform_indices = @transform_2, window_bounds = array<i64: 8, 1>}]} {
    %c0_i32 = arith.constant 0 : i32
    %0 = arith.cmpi eq, %arg1, %c0_i32 : i32
    %1 = arith.extui %0 : i1 to i32
    %c0_i32_0 = arith.constant 0 : i32
    %2 = arith.cmpi ne, %1, %c0_i32_0 : i32
    scf.if %2 {
      %cst_15 = arith.constant 0xFF800000 : f32
      %31 = vector.broadcast %cst_15 : f32 to vector<8x1xf32>
      %c0_16 = arith.constant 0 : index
      %c0_17 = arith.constant 0 : index
      %32 = vector.load %arg5[%c0_16, %c0_17] : memref<8x1xf32, #tpu.memory_space<vmem>>, vector<8x1xf32>
      tpu.vector_store %arg5[%c0_16, %c0_17], %31 {strides = array<i32>} : memref<8x1xf32, #tpu.memory_space<vmem>>, vector<8x1xf32>,
      %cst_18 = arith.constant 0.000000e+00 : f32
      %33 = vector.broadcast %cst_18 : f32 to vector<8x1xf32>
      %c0_19 = arith.constant 0 : index
      %c0_20 = arith.constant 0 : index
      %34 = vector.load %arg6[%c0_19, %c0_20] : memref<8x1xf32, #tpu.memory_space<vmem>>, vector<8x1xf32>
      tpu.vector_store %arg6[%c0_19, %c0_20], %33 {strides = array<i32>} : memref<8x1xf32, #tpu.memory_space<vmem>>, vector<8x1xf32>,
      %cst_21 = arith.constant 0.000000e+00 : f32
      %35 = vector.broadcast %cst_21 : f32 to vector<8x1xf32>
      %c0_22 = arith.constant 0 : index
      %c0_23 = arith.constant 0 : index
      %36 = vector.load %arg7[%c0_22, %c0_23] : memref<8x1xf32, #tpu.memory_space<vmem>>, vector<8x1xf32>
      tpu.vector_store %arg7[%c0_22, %c0_23], %35 {strides = array<i32>} : memref<8x1xf32, #tpu.memory_space<vmem>>, vector<8x1xf32>,
    } else {
    }
    %c0 = arith.constant 0 : index
    %c0_1 = arith.constant 0 : index
    %3 = vector.load %arg2[%c0, %c0_1] : memref<8x128xf32, #tpu.memory_space<vmem>>, vector<8x128xf32>
    %c0_2 = arith.constant 0 : index
    %c0_3 = arith.constant 0 : index
    %4 = vector.load %arg3[%c0_2, %c0_3] : memref<8x128xf32, #tpu.memory_space<vmem>>, vector<8x128xf32>
    %cst = arith.constant dense<0.000000e+00> : vector<8x8xf32>
    %5 = tpu.matmul %3, %4, %cst {dimension_numbers = #tpu.dot_dimension_numbers<[1], [1], [0], [0], [0, 0, 1, 0], [], []>} : vector<8x128xf32>, vector<8x128xf32>, vector<8x8xf32> -> vector<8x8xf32>
    %c8_i32 = arith.constant 8 : i32
    %6 = arith.muli %arg1, %c8_i32 : i32
    %c8_i32_4 = arith.constant 8 : i32
    %7 = arith.muli %arg0, %c8_i32_4 : i32
    %8 = arith.subi %6, %7 : i32
    %c7_i32 = arith.constant 7 : i32
    %9 = arith.subi %8, %c7_i32 : i32
    %c7_i32_5 = arith.constant 7 : i32
    %10 = arith.addi %8, %c7_i32_5 : i32
    %c0_i32_6 = arith.constant 0 : i32
    %11 = arith.cmpi sle, %9, %c0_i32_6 : i32
    %c0_i32_7 = arith.constant 0 : i32
    %12 = arith.cmpi sge, %10, %c0_i32_7 : i32
    %13 = arith.andi %11, %12 : i1
    %c4_i32 = arith.constant 4 : i32
    %14 = arith.cmpi sle, %9, %c4_i32 : i32
    %c4_i32_8 = arith.constant 4 : i32
    %15 = arith.cmpi sge, %10, %c4_i32_8 : i32
    %16 = arith.andi %14, %15 : i1
    %c-4_i32 = arith.constant -4 : i32
    %17 = arith.cmpi sle, %9, %c-4_i32 : i32
    %c-4_i32_9 = arith.constant -4 : i32
    %18 = arith.cmpi sge, %10, %c-4_i32_9 : i32
    %19 = arith.andi %17, %18 : i1
    %20 = arith.ori %16, %19 : i1
    %21 = arith.extui %20 : i1 to i32
    %c0_i32_10 = arith.constant 0 : i32
    %22 = arith.cmpi ne, %21, %c0_i32_10 : i32
    scf.if %22 {
      %31 = tpu.iota {dimensions = array<i32: 1>} : vector<8x8xi32>
      %32 = tpu.iota {dimensions = array<i32: 0>} : vector<8x8xi32>
      %33 = arith.subi %31, %32 : vector<8x8xi32>
      %c4_i32_15 = arith.constant 4 : i32
      %34 = arith.subi %c4_i32_15, %8 : i32
      %35 = vector.broadcast %34 : i32 to vector<8x8xi32>
      %36 = arith.cmpi eq, %33, %35 : vector<8x8xi32>
      %c-4_i32_16 = arith.constant -4 : i32
      %37 = arith.subi %c-4_i32_16, %8 : i32
      %38 = vector.broadcast %37 : i32 to vector<8x8xi32>
      %39 = arith.cmpi eq, %33, %38 : vector<8x8xi32>
      %40 = arith.ori %36, %39 : vector<8x8xi1>
      %c0_17 = arith.constant 0 : index
      %c0_18 = arith.constant 0 : index
      %41 = vector.load %arg7[%c0_17, %c0_18] : memref<8x1xf32, #tpu.memory_space<vmem>>, vector<8x1xf32>
      %cst_19 = arith.constant 0.000000e+00 : f32
      %42 = vector.broadcast %cst_19 : f32 to vector<8x8xf32>
      %43 = arith.select %40, %5, %42 : vector<8x8xi1>, vector<8x8xf32>
      %cst_20 = arith.constant dense<0.000000e+00> : vector<8xf32>
      %44 = vector.multi_reduction <add>, %43, %cst_20 [1] : vector<8x8xf32> to vector<8xf32>
      %45 = vector.shape_cast %44 : vector<8xf32> to vector<8x1xf32>
      %46 = arith.addf %41, %45 : vector<8x1xf32>
      %c0_21 = arith.constant 0 : index
      %c0_22 = arith.constant 0 : index
      %47 = vector.load %arg7[%c0_21, %c0_22] : memref<8x1xf32, #tpu.memory_space<vmem>>, vector<8x1xf32>
      tpu.vector_store %arg7[%c0_21, %c0_22], %46 {strides = array<i32>} : memref<8x1xf32, #tpu.memory_space<vmem>>, vector<8x1xf32>,
    } else {
    }
    %23 = arith.extui %13 : i1 to i32
    %c0_i32_11 = arith.constant 0 : i32
    %24 = arith.cmpi ne, %23, %c0_i32_11 : i32
    scf.if %24 {
      %31 = tpu.iota {dimensions = array<i32: 1>} : vector<8x8xi32>
      %32 = tpu.iota {dimensions = array<i32: 0>} : vector<8x8xi32>
      %33 = arith.subi %31, %32 : vector<8x8xi32>
      %c0_i32_15 = arith.constant 0 : i32
      %34 = arith.subi %c0_i32_15, %8 : i32
      %35 = vector.broadcast %34 : i32 to vector<8x8xi32>
      %36 = arith.cmpi eq, %33, %35 : vector<8x8xi32>
      %cst_16 = arith.constant -1.000000e+04 : f32
      %37 = vector.broadcast %cst_16 : f32 to vector<8x8xf32>
      %38 = arith.select %36, %37, %5 : vector<8x8xi1>, vector<8x8xf32>
      %c0_17 = arith.constant 0 : index
      %c0_18 = arith.constant 0 : index
      %39 = vector.load %arg5[%c0_17, %c0_18] : memref<8x1xf32, #tpu.memory_space<vmem>>, vector<8x1xf32>
      %cst_19 = arith.constant dense<0xFF800000> : vector<8xf32>
      %40 = vector.multi_reduction <maximumf>, %38, %cst_19 [1] : vector<8x8xf32> to vector<8xf32>
      %41 = vector.shape_cast %40 : vector<8xf32> to vector<8x1xf32>
      %42 = arith.maximumf %39, %41 : vector<8x1xf32>
      %43 = arith.subf %39, %42 : vector<8x1xf32>
      %44 = math.exp %43 : vector<8x1xf32>
      %c0_20 = arith.constant 0 : index
      %c0_21 = arith.constant 0 : index
      %45 = vector.load %arg6[%c0_20, %c0_21] : memref<8x1xf32, #tpu.memory_space<vmem>>, vector<8x1xf32>
      %46 = arith.mulf %44, %45 : vector<8x1xf32>
      %47 = vector.broadcast %42 : vector<8x1xf32> to vector<8x8xf32>
      %48 = arith.subf %38, %47 : vector<8x8xf32>
      %49 = math.exp %48 : vector<8x8xf32>
      %cst_22 = arith.constant dense<0.000000e+00> : vector<8xf32>
      %50 = vector.multi_reduction <add>, %49, %cst_22 [1] : vector<8x8xf32> to vector<8xf32>
      %51 = vector.shape_cast %50 : vector<8xf32> to vector<8x1xf32>
      %52 = arith.addf %46, %51 : vector<8x1xf32>
      %c0_23 = arith.constant 0 : index
      %c0_24 = arith.constant 0 : index
      %53 = vector.load %arg6[%c0_23, %c0_24] : memref<8x1xf32, #tpu.memory_space<vmem>>, vector<8x1xf32>
      tpu.vector_store %arg6[%c0_23, %c0_24], %52 {strides = array<i32>} : memref<8x1xf32, #tpu.memory_space<vmem>>, vector<8x1xf32>,
      %c0_25 = arith.constant 0 : index
      %c0_26 = arith.constant 0 : index
      %54 = vector.load %arg5[%c0_25, %c0_26] : memref<8x1xf32, #tpu.memory_space<vmem>>, vector<8x1xf32>
      tpu.vector_store %arg5[%c0_25, %c0_26], %42 {strides = array<i32>} : memref<8x1xf32, #tpu.memory_space<vmem>>, vector<8x1xf32>,
    } else {
    }
    %true = arith.constant true
    %25 = arith.xori %13, %true : i1
    %26 = arith.extui %25 : i1 to i32
    %c0_i32_12 = arith.constant 0 : i32
    %27 = arith.cmpi ne, %26, %c0_i32_12 : i32
    scf.if %27 {
      %c0_15 = arith.constant 0 : index
      %c0_16 = arith.constant 0 : index
      %31 = vector.load %arg5[%c0_15, %c0_16] : memref<8x1xf32, #tpu.memory_space<vmem>>, vector<8x1xf32>
      %cst_17 = arith.constant dense<0xFF800000> : vector<8xf32>
      %32 = vector.multi_reduction <maximumf>, %5, %cst_17 [1] : vector<8x8xf32> to vector<8xf32>
      %33 = vector.shape_cast %32 : vector<8xf32> to vector<8x1xf32>
      %34 = arith.maximumf %31, %33 : vector<8x1xf32>
      %35 = arith.subf %31, %34 : vector<8x1xf32>
      %36 = math.exp %35 : vector<8x1xf32>
      %c0_18 = arith.constant 0 : index
      %c0_19 = arith.constant 0 : index
      %37 = vector.load %arg6[%c0_18, %c0_19] : memref<8x1xf32, #tpu.memory_space<vmem>>, vector<8x1xf32>
      %38 = arith.mulf %36, %37 : vector<8x1xf32>
      %39 = vector.broadcast %34 : vector<8x1xf32> to vector<8x8xf32>
      %40 = arith.subf %5, %39 : vector<8x8xf32>
      %41 = math.exp %40 : vector<8x8xf32>
      %cst_20 = arith.constant dense<0.000000e+00> : vector<8xf32>
      %42 = vector.multi_reduction <add>, %41, %cst_20 [1] : vector<8x8xf32> to vector<8xf32>
      %43 = vector.shape_cast %42 : vector<8xf32> to vector<8x1xf32>
      %44 = arith.addf %38, %43 : vector<8x1xf32>
      %c0_21 = arith.constant 0 : index
      %c0_22 = arith.constant 0 : index
      %45 = vector.load %arg6[%c0_21, %c0_22] : memref<8x1xf32, #tpu.memory_space<vmem>>, vector<8x1xf32>
      tpu.vector_store %arg6[%c0_21, %c0_22], %44 {strides = array<i32>} : memref<8x1xf32, #tpu.memory_space<vmem>>, vector<8x1xf32>,
      %c0_23 = arith.constant 0 : index
      %c0_24 = arith.constant 0 : index
      %46 = vector.load %arg5[%c0_23, %c0_24] : memref<8x1xf32, #tpu.memory_space<vmem>>, vector<8x1xf32>
      tpu.vector_store %arg5[%c0_23, %c0_24], %34 {strides = array<i32>} : memref<8x1xf32, #tpu.memory_space<vmem>>, vector<8x1xf32>,
    } else {
    }
    %c0_i32_13 = arith.constant 0 : i32
    %28 = arith.cmpi eq, %arg1, %c0_i32_13 : i32
    %29 = arith.extui %28 : i1 to i32
    %c0_i32_14 = arith.constant 0 : i32
    %30 = arith.cmpi ne, %29, %c0_i32_14 : i32
    scf.if %30 {
      %c0_15 = arith.constant 0 : index
      %c0_16 = arith.constant 0 : index
      %31 = vector.load %arg6[%c0_15, %c0_16] : memref<8x1xf32, #tpu.memory_space<vmem>>, vector<8x1xf32>
      %32 = math.log %31 : vector<8x1xf32>
      %c0_17 = arith.constant 0 : index
      %c0_18 = arith.constant 0 : index
      %33 = vector.load %arg5[%c0_17, %c0_18] : memref<8x1xf32, #tpu.memory_space<vmem>>, vector<8x1xf32>
      %34 = arith.addf %32, %33 : vector<8x1xf32>
      %cst_19 = arith.constant 1.000000e+00 : f32
      %35 = vector.broadcast %cst_19 : f32 to vector<8x1xf32>
      %36 = arith.mulf %35, %34 : vector<8x1xf32>
      %c0_20 = arith.constant 0 : index
      %c0_21 = arith.constant 0 : index
      %37 = vector.load %arg7[%c0_20, %c0_21] : memref<8x1xf32, #tpu.memory_space<vmem>>, vector<8x1xf32>
      %38 = arith.subf %36, %37 : vector<8x1xf32>
      %c0_22 = arith.constant 0 : index
      %c0_23 = arith.constant 0 : index
      %39 = vector.load %arg4[%c0_22, %c0_23] : memref<8x1xf32, #tpu.memory_space<vmem>>, vector<8x1xf32>
      tpu.vector_store %arg4[%c0_22, %c0_23], %38 {strides = array<i32>} : memref<8x1xf32, #tpu.memory_space<vmem>>, vector<8x1xf32>,
    } else {
    }
    return
  }
  func.func @transform_0(%arg0: i32, %arg1: i32) -> (i32, i32) {
    %c0_i32 = arith.constant 0 : i32
    %c0_i32_0 = arith.constant 0 : i32
    return %arg0, %c0_i32 : i32, i32
  }
  func.func @transform_1(%arg0: i32, %arg1: i32) -> (i32, i32) {
    %c0_i32 = arith.constant 0 : i32
    %c0_i32_0 = arith.constant 0 : i32
    return %arg1, %c0_i32 : i32, i32
  }
  func.func @transform_2(%arg0: i32, %arg1: i32) -> (i32, i32) {
    %c0_i32 = arith.constant 0 : i32
    %c0_i32_0 = arith.constant 0 : i32
    return %arg0, %c0_i32 : i32, i32
  }
}

</mosaic_0001>

<bundles_post_ra>
// kernel: tpu_custom_call.1
= control target key start
LH: loop header
LB: loop body
LE: loop exit
PB: predicated region body
PF: predicated region fallthrough
CT: control target
= control target key end

     0   :  { %7 = vsyncpa [#allocation6], 0  ;;  %s373_s0 = inlined_call_operand.hbm [shape: f32[8,128], index: 0, kind: input, shape index: {}]   ;;  %s374_s1 = inlined_call_operand.hbm [shape: f32[8,128], index: 1, kind: input, shape index: {}]   ;;  %s375_s2 = inlined_call_operand.vmem [shape: f32[8,1], index: 2, kind: output, shape index: {}]  }
   0x1   :  { %8 = vsyncpa [#allocation8], 0  ;;  %s309_s9 = smov [#allocation5]   ;;  %s310_s11 = smov [#allocation7]  }
   0x2   :  { %s15_s10 = sshll.u32 %s309_s9, 4  ;;  %s25_s12 = sshll.u32 %s310_s11, 4  ;;  %s16_s10 = int_to_ptr.vmem [resolvable:$true] %s15_s10  ;;  %s26_s12 = int_to_ptr.vmem [resolvable:$true] %s25_s12 }
   0x3   :  { %s261_s15 = scalar_lea.hbm %s373_s0, 128 }
   0x4   :  { %p262_p0 = scmp.ne.s32.totalorder %s373_s0, %s261_s15  ;;  %p265_p1 = scmp.lt.u32.totalorder %s261_s15, %s373_s0 }
   0x6   :  { %p267_p2 = pnand %p265_p1, %p262_p0 }
   0x8   :  { %270 = shalt.err (!%p267_p2)
}
   0x9   :  { %s271_s20 = scalar_lea.vmem %s16_s10, 128  ;;  %p276_p4 = scmp.lt.s32.totalorder %s16_s10, %s16_s10 }
   0xa   :  { %p272_p3 = scmp.ne.s32.totalorder %s16_s10, %s271_s20  ;;  %p277_p5 = scmp.lt.s32.totalorder %s271_s20, %s271_s20 }
   0xc   :  { %p278_p6 = por %p277_p5, %p276_p4 }
   0xe   :  { %p279_p7 = pnand %p278_p6, %p272_p3 }
  0x10   :  { %282 = shalt.err (!%p279_p7)
}
  0x11   :  { %18 = dma.hbm_to_vmem [thread:$0]  %s373_s0, 128, %s16_s10, [#allocation6]  }
  0x12   :  { %s283_s25 = scalar_lea.hbm %s374_s1, 128 }
  0x13   :  { %p284_p8 = scmp.ne.s32.totalorder %s374_s1, %s283_s25  ;;  %p287_p9 = scmp.lt.u32.totalorder %s283_s25, %s374_s1 }
  0x15   :  { %p289_p10 = pnand %p287_p9, %p284_p8 }
  0x17   :  { %292 = shalt.err (!%p289_p10)
}
  0x18   :  { %s293_s30 = scalar_lea.vmem %s26_s12, 128  ;;  %p298_p12 = scmp.lt.s32.totalorder %s26_s12, %s26_s12 }
  0x19   :  { %p294_p11 = scmp.ne.s32.totalorder %s26_s12, %s293_s30  ;;  %p299_p13 = scmp.lt.s32.totalorder %s293_s30, %s293_s30 }
  0x1b   :  { %p300_p0 = por %p299_p13, %p298_p12 }
  0x1d   :  { %p301_p1 = pnand %p300_p0, %p294_p11 }
  0x1f   :  { %304 = shalt.err (!%p301_p1)
}
  0x20   :  { %28 = dma.hbm_to_vmem [thread:$0]  %s374_s1, 128, %s26_s12, [#allocation8]  }
  0x21   :  { %305 = dma.done.wait [#allocation6], 128  }
  0x22   :  { %306 = vsyncadd [#allocation6], 4294967168 }
  0x23   :  { %307 = dma.done.wait [#allocation8], 128  }
  0x24   :  { %308 = vsyncadd [#allocation8], 4294967168  ;;  %vm39_vm0 = vcmask 7168   ;;  %v311_v0 = vmov 0.0   ;;  %vm312_vm1 = vmmov 0   ;;  %v44_v1 = vld [vmem:[#allocation7] sm:$0xff]  ;;  %v136_v4 = vlaneseq }
  0x25   :  { %41 = vst.msk [vmem:[#allocation3] sm:$0xff] %vm39_vm0, %v311_v0  ;;  %42 = vst.msk [vmem:[#allocation4] sm:$0xff] %vm39_vm0, %v311_v0  ;;  %243 = vmatprep.subr.mxu0 %v311_v0  ;;  %245 = vmatprep.mubr.msk.f32.mxu0 %vm312_vm1, %v311_v0  ;;  %v43_v2 = vld [vmem:[#allocation5] sm:$0xff]  ;;  %v313_v3 = vmov -inf   ;;  %vm150_vm6 = vcmask 64512   ;;  %v314_v14 = vmov 0  }
  0x26   :  { %244 = vmatpush3.xpose.msra.mxu0 %v44_v1  ;;  %40 = vst.msk [vmem:[#allocation2] sm:$0xff] %vm39_vm0, %v313_v3  ;;  %v137_v5 = vand.u32 127, %v136_v4  ;;  %v139_v6 = vshrl.u32 %v136_v4, 7  ;;  %254 = vset.pattern.permute.xlu0 %v314_v14 }
  0x28   :  { %v140_v7 = vsub.s32 %v137_v5, %v139_v6 }
  0x29   :  { %246 = vmatmul.mubr.f32.vlgmr.msra.gmra.mrb[0].mxu0 %v43_v2 }
  0x2a   :  { %vm143_vm2 = vcmp.eq.s32.totalorder %v140_v7, 4  ;;  %vm146_vm3 = vcmp.eq.s32.totalorder %v140_v7, 4294967292  ;;  %vm166_vm4 = vcmp.eq.s32.totalorder %v140_v7, 0 }
  0x2b   :  { %vm357_vm5 = vmor %vm143_vm2, %vm146_vm3 }
  0x2c   :  { %v177_v27 = vld [vmem:[#allocation3] sm:$0xff]  ;;  %v148_v31 = vld [vmem:[#allocation4] sm:$0xff] }
  0x2d   :  { %v168_v15 = vld [vmem:[#allocation2] sm:$0xff] }
  0xfc   :  { %v111_v9 = vpop.f32.mrb[0].mxu0 }
  0xfd   :  { %v247_v10 = vpop.f32.mrb[1].mxu0  ;;  %v167_v11 = vsel %vm166_vm4, -10000.0, %v111_v9  ;;  %v149_v12 = vsel %vm357_vm5, %v111_v9, 0.0 }
  0xfe   :  { %v170_v13 = vsel %vm150_vm6, %v167_v11, -inf  ;;  %v151_v24 = vsel %vm150_vm6, %v149_v12, 0.0 }
  0xff   :  { %171 = vmax.xlane.f32.xlu0 %v170_v13 }
 0x18c   :  { %v172_v16 = vpop.xlane.xlu0 %171 }
 0x18d   :  { %v173_v17 = vmax.f32 %v168_v15, %v172_v16 }
 0x18f   :  { %v174_v18 = vsub.f32 %v168_v15, %v173_v17  ;;  %193 = vst.msk [vmem:[#allocation2] sm:$0xff] %vm39_vm0, %v173_v17  ;;  %181 = vperm.xlu0 %254, %v173_v17  }
 0x191   :  { %v175_v25 = vmul.f32 1.442695, %v174_v18 }
 0x196   :  { %v229_v37 = vld [vmem:[#allocation2] sm:$0xff] }
 0x20e   :  { %v182_v19 = vpop.permute.xlu0 %181 }
 0x20f   :  { %v184_v20 = vsub.f32 %v167_v11, %v182_v19 }
 0x211   :  { %v185_v21 = vmul.f32 1.442695, %v184_v20 }
 0x213   :  { %255 = vpow2.f32 %v185_v21 }
 0x214   :  { %257 = vpow2.f32 %v175_v25 }
 0x21d   :  { %v256_v22 = vpop.eup %255 }
 0x21e   :  { %v187_v23 = vsel %vm150_vm6, %v256_v22, 0.0  ;;  %v258_v26 = vpop.eup %257 }
 0x21f   :  { %188 = vadd.xlane.f32.xlu1 %v187_v23  ;;  %v178_v28 = vmul.f32 %v258_v26, %v177_v27 }
 0x223   :  { %152 = vadd.xlane.f32.xlu1 %v151_v24 }
 0x2ac   :  { %v189_v29 = vpop.xlane.xlu1 %188 }
 0x2ad   :  { %v190_v30 = vadd.f32 %v189_v29, %v178_v28 }
 0x2af   :  { %192 = vst.msk [vmem:[#allocation3] sm:$0xff] %vm39_vm0, %v190_v30 }
 0x2b0   :  { %v153_v32 = vpop.xlane.xlu1 %152 }
 0x2b1   :  { %v154_v33 = vadd.f32 %v153_v32, %v148_v31 }
 0x2b3   :  { %156 = vst.msk [vmem:[#allocation4] sm:$0xff] %vm39_vm0, %v154_v33 }
 0x2b6   :  { %v226_v34 = vld [vmem:[#allocation3] sm:$0xff] }
 0x2b7   :  { %259 = vlog2.f32 %v226_v34 }
 0x2ba   :  { %v231_v39 = vld [vmem:[#allocation4] sm:$0xff] }
 0x2c1   :  { %v260_v35 = vpop.eup %259 }
 0x2c2   :  { %v228_v36 = vmul.f32 0.6931472, %v260_v35 }
 0x2c4   :  { %v230_v38 = vadd.f32 %v229_v37, %v228_v36 }
 0x2c6   :  { %v232_v40 = vsub.f32 %v230_v38, %v231_v39 }
 0x2c8   :  { %234 = vst.msk [vmem:[%s375_s2] sm:$0xff] %vm39_vm0, %v232_v40 }
 0x2c9   :  { %239 = vsyncpa [#allocation6], 1 }
 0x2ca   :  { %240 = vsyncpa [#allocation8], 1 }

</bundles_post_ra>
